<compile_context>
chip_gen: v5e
topology: v5e:2x2
jax: 0.10.0
libtpu: 0.0.40
codegen_flags: <defaults>
</compile_context>

<pallas_src>
import jax
import jax.numpy as jnp
from jax import lax
from jax.experimental import pallas as pl
from jax.experimental.pallas import tpu as pltpu


def _round_up(x, m):
    return (x + m - 1) // m * m


def _gather_rows_kernel(idx_ref, src_ref, out_ref):
    """out_tile[r] = src[idx_tile[r]] if idx_tile[r] >= 0 else 0, via one-hot matmul."""
    idx = idx_ref[...]                                    # (tile, 1) int32, -1 => zero row
    n_src = src_ref.shape[0]
    tile = idx.shape[0]
    one_hot = (idx == lax.broadcasted_iota(jnp.int32, (tile, n_src), 1)
               ).astype(src_ref.dtype)
    out_ref[...] = jnp.dot(one_hot, src_ref[...],
                           preferred_element_type=jnp.float32,
                           precision=lax.Precision.HIGHEST).astype(out_ref.dtype)


def scatter_rows(src, indices, n_out, *, row_tile=512):
    """Pallas scatter: out[n_out, C] with out[indices[i]] = src[i], zeros elsewhere."""
    n_src, c = src.shape
    if n_out == 0 or c == 0 or n_src == 0:
        return jnp.zeros((n_out, c), src.dtype)

    # Inverse map (one cheap XLA scatter on an int vector): inv[dst] = src row, else -1.
    # OOB destination indices are dropped here, so the kernel cannot write out of bounds.
    inv = jnp.full((n_out,), -1, jnp.int32).at[indices].set(
        jnp.arange(n_src, dtype=jnp.int32), mode="drop")
    inv2d = inv[:, None]                                  # (n_out, 1)

    tile = min(row_tile, _round_up(n_out, 8))             # destination rows per grid step
    grid = pl.cdiv(n_out, tile)

    return pl.pallas_call(
        _gather_rows_kernel,
        out_shape=jax.ShapeDtypeStruct((n_out, c), src.dtype),
        grid=(grid,),
        in_specs=[
            pl.BlockSpec((tile, 1), lambda i: (i, 0)),    # inverse indices, tiled with output
            pl.BlockSpec((n_src, c), lambda i: (0, 0)),   # full source, VMEM-resident
        ],
        out_specs=pl.BlockSpec((tile, c), lambda i: (i, 0)),  # lane-dense full-tile stores
        compiler_params=pltpu.CompilerParams(
            dimension_semantics=("parallel",)),           # v7x: both TCs split the tiles
    )(inv2d, src)


def unpool_forward(x, edge_attr, i, pool_indices, pool_edges, unpooled_edge_index, n_nodes):
    """Pallas equivalent of Unpool.forward: returns (new_x, new_edge_attr, edge_index, i)."""
    new_x = scatter_rows(x, pool_indices, n_nodes)
    n_edges_unpooled = unpooled_edge_index.shape[1]
    new_edge_attr = scatter_rows(edge_attr, pool_edges, n_edges_unpooled)
    # edge_index and the level counter `i` are pure passthroughs in the original module.
    return new_x, new_edge_attr, unpooled_edge_index, i


if __name__ == "__main__":
    key = jax.random.PRNGKey(0)
    k1, k2, k3, k4, k5, k6 = jax.random.split(key, 6)

    n_nodes = 64            # unpooled node count
    n_pooled = 24           # pooled node count
    hidden = 32             # hidden_channels (node feature dim)
    n_edges_unpooled = 96   # edges in the unpooled graph
    n_edges_pooled = 40     # edges kept in the pooled graph
    edge_dim = 8            # edge_attr feature dim

    x = jax.random.normal(k1, (n_pooled, hidden), jnp.float32)
    edge_attr = jax.random.normal(k2, (n_edges_pooled, edge_dim), jnp.float32)
    pool_indices = jax.random.permutation(k3, n_nodes)[:n_pooled]
    pool_edges = jax.random.permutation(k4, n_edges_unpooled)[:n_edges_pooled]
    unpooled_edge_index = jnp.stack([
        jax.random.randint(k5, (n_edges_unpooled,), 0, n_nodes),
        jax.random.randint(k6, (n_edges_unpooled,), 0, n_nodes),
    ]).astype(jnp.int32)
    i_level = 1

    new_x, new_edge_attr, edge_index_out, i_out = unpool_forward(
        x, edge_attr, i_level, pool_indices, pool_edges, unpooled_edge_index, n_nodes)
    jax.block_until_ready((new_x, new_edge_attr))

    # Plain-JAX reference (mirrors the PyTorch module exactly).
    ref_x = jnp.zeros((n_nodes, hidden), x.dtype).at[pool_indices].set(x)
    ref_e = jnp.zeros((n_edges_unpooled, edge_dim), edge_attr.dtype).at[pool_edges].set(edge_attr)

    assert new_x.shape == (n_nodes, hidden)
    assert new_edge_attr.shape == (n_edges_unpooled, edge_dim)
    assert jnp.allclose(new_x, ref_x, atol=1e-6, rtol=1e-6)
    assert jnp.allclose(new_edge_attr, ref_e, atol=1e-6, rtol=1e-6)
    assert jnp.array_equal(edge_index_out, unpooled_edge_index)
    assert i_out == i_level

    print("KERNEL_OK")
</pallas_src>

<mosaic_0001>
module attributes {stable_mosaic.version = 11 : i64} {
  func.func @_gather_rows_kernel(%arg0: i32, %arg1: memref<64x1xi32, #tpu.memory_space<vmem>>, %arg2: memref<24x32xf32, #tpu.memory_space<vmem>>, %arg3: memref<64x32xf32, #tpu.memory_space<vmem>>) attributes {dimension_semantics = [#tpu.dimension_semantics<parallel>], iteration_bounds = array<i64: 1>, scalar_prefetch = 0 : i64, scratch_operands = 0 : i64, tpu.core_type = #tpu.core_type<tc>, window_params = [{transform_indices = @transform_0, window_bounds = array<i64: 64, 1>}, {pipeline_mode = #tpu.pipeline_mode<synchronous>, transform_indices = @transform_1, window_bounds = array<i64: 24, 32>}, {transform_indices = @transform_2, window_bounds = array<i64: 64, 32>}]} {
    %c0 = arith.constant 0 : index
    %c0_0 = arith.constant 0 : index
    %0 = vector.load %arg1[%c0, %c0_0] : memref<64x1xi32, #tpu.memory_space<vmem>>, vector<64x1xi32>
    %1 = tpu.iota {dimensions = array<i32: 1>} : vector<64x24xi32>
    %2 = vector.broadcast %0 : vector<64x1xi32> to vector<64x24xi32>
    %3 = arith.cmpi eq, %2, %1 : vector<64x24xi32>
    %4 = arith.extui %3 : vector<64x24xi1> to vector<64x24xi32>
    %5 = arith.sitofp %4 : vector<64x24xi32> to vector<64x24xf32>
    %c0_1 = arith.constant 0 : index
    %c0_2 = arith.constant 0 : index
    %6 = vector.load %arg2[%c0_1, %c0_2] : memref<24x32xf32, #tpu.memory_space<vmem>>, vector<24x32xf32>
    %cst = arith.constant dense<0.000000e+00> : vector<64x32xf32>
    %7 = tpu.matmul %5, %6, %cst {dimension_numbers = #tpu.dot_dimension_numbers<[1], [0], [0], [1], [0, 0, 1, 1], [], []>, precision = #tpu.contract_precision<fp32>} : vector<64x24xf32>, vector<24x32xf32>, vector<64x32xf32> -> vector<64x32xf32>
    %c0_3 = arith.constant 0 : index
    %c0_4 = arith.constant 0 : index
    %8 = vector.load %arg3[%c0_3, %c0_4] : memref<64x32xf32, #tpu.memory_space<vmem>>, vector<64x32xf32>
    tpu.vector_store %arg3[%c0_3, %c0_4], %7 {strides = array<i32>} : memref<64x32xf32, #tpu.memory_space<vmem>>, vector<64x32xf32>,
    return
  }
  func.func @transform_0(%arg0: i32) -> (i32, i32) {
    %c0_i32 = arith.constant 0 : i32
    %c0_i32_0 = arith.constant 0 : i32
    return %arg0, %c0_i32 : i32, i32
  }
  func.func @transform_1(%arg0: i32) -> (i32, i32) {
    %c0_i32 = arith.constant 0 : i32
    %c0_i32_0 = arith.constant 0 : i32
    %c0_i32_1 = arith.constant 0 : i32
    return %c0_i32, %c0_i32_0 : i32, i32
  }
  func.func @transform_2(%arg0: i32) -> (i32, i32) {
    %c0_i32 = arith.constant 0 : i32
    %c0_i32_0 = arith.constant 0 : i32
    return %arg0, %c0_i32 : i32, i32
  }
}

</mosaic_0001>

<bundles_post_ra>
// kernel: tpu_custom_call.1
= control target key start
LH: loop header
LB: loop body
LE: loop exit
PB: predicated region body
PF: predicated region fallthrough
CT: control target
= control target key end

     0   :  { %v542_v0 = vmov 0   ;;  %v19_v27 = vlaneseq  ;;  %v543_v30 = vmov 0.0   ;;  %vm72_vm1 = vcmask 195584   ;;  %s736_s0 = inlined_call_operand.vmem [shape: s32[64,1], index: 0, kind: input, shape index: {}]   ;;  %s737_s1 = inlined_call_operand.vmem [shape: f32[24,32], index: 1, kind: input, shape index: {}]   ;;  %s738_s2 = inlined_call_operand.vmem [shape: f32[64,32], index: 2, kind: output, shape index: {}]  }
   0x1   :  { %540 = vset.pattern.permute.xlu1 %v542_v0  ;;  %539 = vset.pattern.permute.xlu0 %v542_v0  ;;  %v15_v1 = vld [vmem:[%s736_s0 + $0x20] sm:$0xff]  ;;  %v12_v3 = vld [vmem:[%s736_s0 + $0x8] sm:$0xff]  ;;  %v71_v4 = vld [vmem:[%s737_s1 + $0x10] sm:$0xff]  ;;  %vm486_vm9 = vcmask 261120  }
   0x2   :  { %v11_v2 = vld [vmem:[%s736_s0] sm:$0xff]  ;;  %34 = vperm.xlu0 %539, %v15_v1   ;;  %541 = vset.pattern.permute.xlu2 %v542_v0  ;;  %v110_v5 = vand.u32 4294901760, %v71_v4  ;;  %v70_v6 = vld [vmem:[%s737_s1 + $0x8] sm:$0xff]  ;;  %v17_v10 = vld [vmem:[%s736_s0 + $0x30] sm:$0xff]  ;;  %v20_v28 = vand.u32 127, %v19_v27 }
   0x3   :  { %22 = vperm.xlu1 %540, %v11_v2   ;;  %25 = vperm.xlu2 %541, %v12_v3   ;;  %v112_v7 = vand.u32 4294901760, %v70_v6  ;;  %v16_v9 = vld [vmem:[%s736_s0 + $0x28] sm:$0xff]  ;;  %v18_v13 = vld [vmem:[%s736_s0 + $0x38] sm:$0xff]  ;;  %v13_v19 = vld [vmem:[%s736_s0 + $0x10] sm:$0xff] }
   0x4   :  { %v195_v8 = vsub.f32 %v71_v4, %v110_v5  ;;  %111 = vmatpush.msra.mxu0 %v110_v5  ;;  %531 = vmatpush.msra.mxu2 %v110_v5  ;;  %v14_v20 = vld [vmem:[%s736_s0 + $0x18] sm:$0xff]  ;;  %v69_v21 = vld [vmem:[%s737_s1] sm:$0xff] }
   0x5   :  { %v201_v11 = vsub.f32 %v70_v6, %v112_v7  ;;  %v114_v22 = vand.u32 4294901760, %v69_v21 }
   0x6   :  { %v196_v12 = vand.u32 4294901760, %v195_v8  ;;  %113 = vmatpush.msra.mxu0 %v112_v7  ;;  %532 = vmatpush.msra.mxu2 %v112_v7 }
   0x7   :  { %v202_v14 = vand.u32 4294901760, %v201_v11  ;;  %v207_v23 = vsub.f32 %v69_v21, %v114_v22 }
   0x8   :  { %v197_v15 = vsub.f32 %v195_v8, %v196_v12  ;;  %115 = vmatpush.msra.mxu0 %v114_v22  ;;  %533 = vmatpush.msra.mxu2 %v114_v22 }
   0x9   :  { %v203_v16 = vsub.f32 %v201_v11, %v202_v14  ;;  %v208_v24 = vand.u32 4294901760, %v207_v23 }
   0xa   :  { %37 = vperm.xlu0 %539, %v16_v9   ;;  %v198_v17 = vand.u32 4294901760, %v197_v15  ;;  %260 = vmatpush.msrb.mxu2 %v195_v8 }
   0xb   :  { %40 = vperm.xlu1 %540, %v17_v10   ;;  %43 = vperm.xlu2 %541, %v18_v13   ;;  %v204_v18 = vand.u32 4294901760, %v203_v16  ;;  %v209_v25 = vsub.f32 %v207_v23, %v208_v24 }
   0xc   :  { %199 = vmatpush.msra.mxu1 %v198_v17  ;;  %534 = vmatpush.msra.mxu3 %v198_v17 }
   0xd   :  { %392 = vmatpush.msrb.mxu0 %v196_v12  ;;  %263 = vmatpush.msrb.mxu2 %v201_v11  ;;  %v210_v26 = vand.u32 4294901760, %v209_v25 }
   0xe   :  { %205 = vmatpush.msra.mxu1 %v204_v18  ;;  %535 = vmatpush.msra.mxu3 %v204_v18 }
   0xf   :  { %396 = vmatpush.msrb.mxu0 %v202_v14  ;;  %266 = vmatpush.msrb.mxu2 %v207_v23 }
  0x10   :  { %211 = vmatpush.msra.mxu1 %v210_v26  ;;  %536 = vmatpush.msra.mxu3 %v210_v26 }
  0x11   :  { %400 = vmatpush.msrb.mxu0 %v208_v24 }
  0x12   :  { %28 = vperm.xlu0 %539, %v13_v19   ;;  %322 = vmatpush.msrb.mxu3 %v110_v5 }
  0x13   :  { %31 = vperm.xlu1 %540, %v14_v20   ;;  %448 = vmatpush.msrb.mxu1 %v110_v5 }
  0x14   :  { %324 = vmatpush.msrb.mxu3 %v112_v7 }
  0x15   :  { %450 = vmatpush.msrb.mxu1 %v112_v7 }
  0x16   :  { %326 = vmatpush.msrb.mxu3 %v114_v22 }
  0x17   :  { %452 = vmatpush.msrb.mxu1 %v114_v22 }
  0x5d   :  { %v26_v29 = vpop.permute.xlu2 %25 }
  0x5e   :  { %vm46_vm0 = vcmp.eq.s32.totalorder %v26_v29, %v20_v28 }
  0x5f   :  { %v592_v31 = vsel %vm46_vm0, 1.0, %v543_v30 }
  0x60   :  { %v77_v34 = vsel %vm72_vm1, %v592_v31, 0 }
  0x61   :  { %v612_v41 = vsub.f32 %v77_v34, %v77_v34 }
  0x63   :  { %v126_v48 = vand.u32 4294901760, %v612_v41 }
  0x65   :  { %v44_v53 = vpop.permute.xlu2 %43  ;;  %v127_v57 = vsub.f32 %v612_v41, %v126_v48 }
  0x66   :  { %vm52_vm6 = vcmp.eq.s32.totalorder %v44_v53, %v20_v28 }
  0x67   :  { %v639_v60 = vsel %vm52_vm6, 1.0, %v543_v30  ;;  %v128_v63 = vand.u32 4294901760, %v127_v57 }
  0x68   :  { %v95_v5 = vsel %vm72_vm1, %v639_v60, 0 }
  0x69   :  { %v173_v9 = vsub.f32 %v95_v5, %v95_v5 }
  0x6b   :  { %v174_v17 = vand.u32 4294901760, %v173_v9 }
  0x6d   :  { %v175_v19 = vsub.f32 %v173_v9, %v174_v17 }
  0x6f   :  { %v176_v21 = vand.u32 4294901760, %v175_v19 }
  0x74   :  { %v35_v32 = vpop.permute.xlu0 %34 }
  0x75   :  { %v23_v33 = vpop.permute.xlu1 %22  ;;  %vm49_vm2 = vcmp.eq.s32.totalorder %v35_v32, %v20_v28 }
  0x76   :  { %vm45_vm3 = vcmp.eq.s32.totalorder %v23_v33, %v20_v28  ;;  %v596_v35 = vsel %vm49_vm2, 1.0, %v543_v30 }
  0x77   :  { %v598_v36 = vsel %vm45_vm3, 1.0, %v543_v30  ;;  %v86_v37 = vsel %vm72_vm1, %v596_v35, 0  ;;  %511 = vmatmul.msk.f32.vlgmr.msra.gmra.mxu3 %vm72_vm1, %v596_v35 }
  0x78   :  { %v74_v38 = vsel %vm72_vm1, %v598_v36, 0  ;;  %507 = vmatmul.msk.f32.vlgmr.msra.gmra.mxu1 %vm72_vm1, %v598_v36  ;;  %v608_v39 = vsub.f32 %v86_v37, %v86_v37 }
  0x79   :  { %v610_v40 = vsub.f32 %v74_v38, %v74_v38 }
  0x7a   :  { %v150_v43 = vand.u32 4294901760, %v608_v39 }
  0x7b   :  { %v118_v42 = vand.u32 4294901760, %v610_v40 }
  0x7c   :  { %v38_v44 = vpop.permute.xlu0 %37  ;;  %v151_v47 = vsub.f32 %v608_v39, %v150_v43 }
  0x7d   :  { %v41_v45 = vpop.permute.xlu1 %40  ;;  %v119_v46 = vsub.f32 %v610_v40, %v118_v42  ;;  %vm50_vm4 = vcmp.eq.s32.totalorder %v38_v44, %v20_v28 }
  0x7e   :  { %vm51_vm5 = vcmp.eq.s32.totalorder %v41_v45, %v20_v28  ;;  %v621_v49 = vsel %vm50_vm4, 1.0, %v543_v30  ;;  %v152_v52 = vand.u32 4294901760, %v151_v47 }
  0x7f   :  { %v623_v50 = vsel %vm51_vm5, 1.0, %v543_v30  ;;  %v120_v51 = vand.u32 4294901760, %v119_v46  ;;  %v89_v54 = vsel %vm72_vm1, %v621_v49, 0  ;;  %512 = vmatmul.msk.f32.gmra.mxu3 %vm72_vm1, %v621_v49 }
  0x80   :  { %v92_v55 = vsel %vm72_vm1, %v623_v50, 0  ;;  %508 = vmatmul.msk.f32.gmra.mxu1 %vm72_vm1, %v592_v31  ;;  %v633_v56 = vsub.f32 %v89_v54, %v89_v54  ;;  %153 = vmatmul.f32.vlgmr.msra.gmra.mxu2 %v152_v52 }
  0x81   :  { %121 = vmatmul.f32.vlgmr.msra.gmra.mxu0 %v120_v51  ;;  %v636_v58 = vsub.f32 %v92_v55, %v92_v55 }
  0x82   :  { %v158_v59 = vand.u32 4294901760, %v633_v56 }
  0x83   :  { %v166_v4 = vand.u32 4294901760, %v636_v58 }
  0x84   :  { %v29_v61 = vpop.permute.xlu0 %28  ;;  %v159_v0 = vsub.f32 %v633_v56, %v158_v59 }
  0x85   :  { %v32_v62 = vpop.permute.xlu1 %31  ;;  %vm47_vm7 = vcmp.eq.s32.totalorder %v29_v61, %v20_v28  ;;  %v167_v12 = vsub.f32 %v636_v58, %v166_v4 }
  0x86   :  { %vm48_vm8 = vcmp.eq.s32.totalorder %v32_v62, %v20_v28  ;;  %v501_v1 = vsel %vm47_vm7, 1.0, %v543_v30  ;;  %v160_v3 = vand.u32 4294901760, %v159_v0 }
  0x87   :  { %v502_v2 = vsel %vm48_vm8, 1.0, %v543_v30  ;;  %v80_v6 = vsel %vm72_vm1, %v501_v1, 0  ;;  %513 = vmatmul.msk.f32.gmra.mxu3 %vm72_vm1, %v623_v50  ;;  %v168_v15 = vand.u32 4294901760, %v167_v12 }
  0x88   :  { %v83_v7 = vsel %vm72_vm1, %v502_v2, 0  ;;  %509 = vmatmul.msk.f32.gmra.mxu1 %vm72_vm1, %v501_v1  ;;  %v133_v8 = vsub.f32 %v80_v6, %v80_v6  ;;  %161 = vmatmul.f32.gmra.mxu2 %v160_v3 }
  0x89   :  { %129 = vmatmul.f32.gmra.mxu0 %v128_v63  ;;  %v141_v10 = vsub.f32 %v83_v7, %v83_v7 }
  0x8a   :  { %v134_v11 = vand.u32 4294901760, %v133_v8 }
  0x8b   :  { %v142_v16 = vand.u32 4294901760, %v141_v10 }
  0x8c   :  { %v135_v13 = vsub.f32 %v133_v8, %v134_v11 }
  0x8d   :  { %v143_v18 = vsub.f32 %v141_v10, %v142_v16 }
  0x8e   :  { %v136_v14 = vand.u32 4294901760, %v135_v13 }
  0x8f   :  { %514 = vmatmul.msk.f32.gmra.mxu3 %vm72_vm1, %v639_v60  ;;  %v144_v20 = vand.u32 4294901760, %v143_v18 }
  0x90   :  { %510 = vmatmul.msk.f32.gmra.mxu1 %vm72_vm1, %v502_v2  ;;  %169 = vmatmul.f32.gmra.mxu2 %v168_v15 }
  0x91   :  { %137 = vmatmul.f32.gmra.mxu0 %v136_v14 }
  0x97   :  { %330 = vmatmul.f32.vlgmr.msrb.gmra.mxu3 %v118_v42 }
  0x98   :  { %523 = vmatmul.msk.f32.vlgmr.msrb.gmra.mxu1 %vm72_vm1, %v598_v36  ;;  %177 = vmatmul.f32.gmra.mxu2 %v176_v21 }
  0x99   :  { %145 = vmatmul.f32.gmra.mxu0 %v144_v20 }
  0x9f   :  { %336 = vmatmul.f32.gmra.mxu3 %v126_v48 }
  0xa0   :  { %524 = vmatmul.msk.f32.gmra.mxu1 %vm72_vm1, %v592_v31  ;;  %269 = vmatmul.f32.vlgmr.msrb.gmra.mxu2 %v610_v40 }
  0xa1   :  { %515 = vmatmul.msk.f32.vlgmr.msrb.gmra.mxu0 %vm72_vm1, %v598_v36 }
  0xa7   :  { %342 = vmatmul.f32.gmra.mxu3 %v134_v11 }
  0xa8   :  { %525 = vmatmul.msk.f32.gmra.mxu1 %vm72_vm1, %v501_v1  ;;  %274 = vmatmul.f32.gmra.mxu2 %v612_v41 }
  0xa9   :  { %516 = vmatmul.msk.f32.gmra.mxu0 %vm72_vm1, %v592_v31 }
  0xaf   :  { %348 = vmatmul.f32.gmra.mxu3 %v142_v16 }
  0xb0   :  { %526 = vmatmul.msk.f32.gmra.mxu1 %vm72_vm1, %v502_v2  ;;  %279 = vmatmul.f32.gmra.mxu2 %v133_v8 }
  0xb1   :  { %517 = vmatmul.msk.f32.gmra.mxu0 %vm72_vm1, %v501_v1 }
  0xb7   :  { %354 = vmatmul.f32.gmra.mxu3 %v150_v43 }
  0xb8   :  { %527 = vmatmul.msk.f32.gmra.mxu1 %vm72_vm1, %v596_v35  ;;  %284 = vmatmul.f32.gmra.mxu2 %v141_v10 }
  0xb9   :  { %518 = vmatmul.msk.f32.gmra.mxu0 %vm72_vm1, %v502_v2 }
  0xbf   :  { %360 = vmatmul.f32.gmra.mxu3 %v158_v59 }
  0xc0   :  { %528 = vmatmul.msk.f32.gmra.mxu1 %vm72_vm1, %v621_v49  ;;  %289 = vmatmul.f32.gmra.mxu2 %v608_v39 }
  0xc1   :  { %519 = vmatmul.msk.f32.gmra.mxu0 %vm72_vm1, %v596_v35 }
  0xc7   :  { %366 = vmatmul.f32.gmra.mxu3 %v166_v4 }
  0xc8   :  { %529 = vmatmul.msk.f32.gmra.mxu1 %vm72_vm1, %v623_v50  ;;  %294 = vmatmul.f32.gmra.mxu2 %v633_v56 }
  0xc9   :  { %520 = vmatmul.msk.f32.gmra.mxu0 %vm72_vm1, %v621_v49 }
  0xcf   :  { %372 = vmatmul.f32.gmra.mxu3 %v174_v17 }
  0xd0   :  { %530 = vmatmul.msk.f32.gmra.mxu1 %vm72_vm1, %v639_v60  ;;  %299 = vmatmul.f32.gmra.mxu2 %v636_v58 }
  0xd1   :  { %521 = vmatmul.msk.f32.gmra.mxu0 %vm72_vm1, %v623_v50 }
  0xd8   :  { %304 = vmatmul.f32.gmra.mxu2 %v173_v9 }
  0xd9   :  { %522 = vmatmul.msk.f32.gmra.mxu0 %vm72_vm1, %v639_v60 }
  0xf5   :  { %v214_v22 = vpop.f32.mrf.mxu1 }
  0xfa   :  { %v230_v23 = vpop.f32.mrf.mxu3 }
  0xfd   :  { %v218_v24 = vpop.f32.mrf.mxu1 }
  0xfe   :  { %v122_v25 = vpop.f32.mrf.mxu0 }
  0xff   :  { %v215_v41 = vadd.f32 %v214_v22, %v122_v25 }
 0x102   :  { %v689_v26 = vpop.f32.mrf.mxu3 }
 0x103   :  { %v154_v27 = vpop.f32.mrf.mxu2 }
 0x104   :  { %v231_v11 = vadd.f32 %v230_v23, %v154_v27 }
 0x105   :  { %v222_v29 = vpop.f32.mrf.mxu1 }
 0x106   :  { %v130_v28 = vpop.f32.mrf.mxu0 }
 0x107   :  { %v219_v49 = vadd.f32 %v218_v24, %v130_v28 }
 0x10a   :  { %v691_v30 = vpop.f32.mrf.mxu3 }
 0x10b   :  { %v162_v31 = vpop.f32.mrf.mxu2 }
 0x10c   :  { %v235_v19 = vadd.f32 %v689_v26, %v162_v31 }
 0x10d   :  { %v226_v33 = vpop.f32.mrf.mxu1 }
 0x10e   :  { %v138_v32 = vpop.f32.mrf.mxu0 }
 0x10f   :  { %v223_v58 = vadd.f32 %v222_v29, %v138_v32 }
 0x112   :  { %v693_v34 = vpop.f32.mrf.mxu3 }
 0x113   :  { %v695_v35 = vpop.f32.mrf.mxu2 }
 0x114   :  { %v239_v28 = vadd.f32 %v691_v30, %v695_v35 }
 0x115   :  { %v455_v38 = vpop.f32.mrf.mxu1 }
 0x116   :  { %v146_v36 = vpop.f32.mrf.mxu0 }
 0x117   :  { %v227_v3 = vadd.f32 %v226_v33, %v146_v36 }
 0x11a   :  { %v331_v37 = vpop.f32.mrf.mxu3 }
 0x11b   :  { %v697_v39 = vpop.f32.mrf.mxu2 }
 0x11d   :  { %v459_v45 = vpop.f32.mrf.mxu1 }
 0x11e   :  { %v403_v40 = vpop.f32.mrf.mxu0 }
 0x122   :  { %v337_v42 = vpop.f32.mrf.mxu3 }
 0x123   :  { %v270_v43 = vpop.f32.mrf.mxu2 }
 0x124   :  { %v271_v44 = vadd.f32 %v270_v43, %v215_v41 }
 0x125   :  { %v463_v56 = vpop.f32.mrf.mxu1 }
 0x126   :  { %v407_v46 = vpop.f32.mrf.mxu0  ;;  %v332_v47 = vadd.f32 %v331_v37, %v271_v44 }
 0x128   :  { %v404_v48 = vadd.f32 %v403_v40, %v332_v47  ;;  %v243_v40 = vadd.f32 %v693_v34, %v697_v39 }
 0x12a   :  { %v456_v50 = vadd.f32 %v455_v38, %v404_v48  ;;  %v343_v51 = vpop.f32.mrf.mxu3 }
 0x12b   :  { %v275_v52 = vpop.f32.mrf.mxu2 }
 0x12c   :  { %487 = vst.msk [vmem:[%s738_s2] sm:$0xff] %vm486_vm9, %v456_v50  ;;  %v276_v53 = vadd.f32 %v275_v52, %v219_v49 }
 0x12d   :  { %v467_v2 = vpop.f32.mrf.mxu1 }
 0x12e   :  { %v411_v54 = vpop.f32.mrf.mxu0  ;;  %v338_v55 = vadd.f32 %v337_v42, %v276_v53 }
 0x130   :  { %v408_v57 = vadd.f32 %v407_v46, %v338_v55 }
 0x132   :  { %v460_v59 = vadd.f32 %v459_v45, %v408_v57  ;;  %v349_v62 = vpop.f32.mrf.mxu3 }
 0x133   :  { %v280_v60 = vpop.f32.mrf.mxu2 }
 0x134   :  { %488 = vst.msk [vmem:[%s738_s2 + $0x8] sm:$0xff] %vm486_vm9, %v460_v59  ;;  %v281_v61 = vadd.f32 %v280_v60, %v223_v58 }
 0x135   :  { %v471_v13 = vpop.f32.mrf.mxu1 }
 0x136   :  { %v344_v63 = vadd.f32 %v343_v51, %v281_v61  ;;  %v415_v0 = vpop.f32.mrf.mxu0 }
 0x138   :  { %v412_v1 = vadd.f32 %v411_v54, %v344_v63 }
 0x13a   :  { %v464_v4 = vadd.f32 %v463_v56, %v412_v1  ;;  %v355_v8 = vpop.f32.mrf.mxu3 }
 0x13b   :  { %v285_v5 = vpop.f32.mrf.mxu2 }
 0x13c   :  { %489 = vst.msk [vmem:[%s738_s2 + $0x10] sm:$0xff] %vm486_vm9, %v464_v4  ;;  %v286_v6 = vadd.f32 %v285_v5, %v227_v3 }
 0x13d   :  { %v475_v24 = vpop.f32.mrf.mxu1 }
 0x13e   :  { %v350_v7 = vadd.f32 %v349_v62, %v286_v6  ;;  %v419_v10 = vpop.f32.mrf.mxu0 }
 0x140   :  { %v416_v9 = vadd.f32 %v415_v0, %v350_v7 }
 0x142   :  { %v468_v12 = vadd.f32 %v467_v2, %v416_v9  ;;  %v361_v18 = vpop.f32.mrf.mxu3 }
 0x143   :  { %v290_v14 = vpop.f32.mrf.mxu2 }
 0x144   :  { %490 = vst.msk [vmem:[%s738_s2 + $0x18] sm:$0xff] %vm486_vm9, %v468_v12  ;;  %v291_v15 = vadd.f32 %v290_v14, %v231_v11 }
 0x145   :  { %v479_v37 = vpop.f32.mrf.mxu1 }
 0x146   :  { %v356_v16 = vadd.f32 %v355_v8, %v291_v15  ;;  %v423_v21 = vpop.f32.mrf.mxu0 }
 0x148   :  { %v420_v17 = vadd.f32 %v419_v10, %v356_v16 }
 0x14a   :  { %v472_v20 = vadd.f32 %v471_v13, %v420_v17  ;;  %v367_v32 = vpop.f32.mrf.mxu3 }
 0x14b   :  { %v295_v22 = vpop.f32.mrf.mxu2 }
 0x14c   :  { %491 = vst.msk [vmem:[%s738_s2 + $0x20] sm:$0xff] %vm486_vm9, %v472_v20  ;;  %v296_v23 = vadd.f32 %v295_v22, %v235_v19 }
 0x14d   :  { %v483_v46 = vpop.f32.mrf.mxu1 }
 0x14e   :  { %v362_v25 = vadd.f32 %v361_v18, %v296_v23  ;;  %v427_v31 = vpop.f32.mrf.mxu0 }
 0x150   :  { %v424_v27 = vadd.f32 %v423_v21, %v362_v25 }
 0x152   :  { %v476_v29 = vadd.f32 %v475_v24, %v424_v27  ;;  %v373_v35 = vpop.f32.mrf.mxu3 }
 0x153   :  { %v300_v33 = vpop.f32.mrf.mxu2 }
 0x154   :  { %492 = vst.msk [vmem:[%s738_s2 + $0x28] sm:$0xff] %vm486_vm9, %v476_v29  ;;  %v301_v26 = vadd.f32 %v300_v33, %v239_v28 }
 0x156   :  { %v368_v36 = vadd.f32 %v367_v32, %v301_v26  ;;  %v431_v44 = vpop.f32.mrf.mxu0 }
 0x158   :  { %v428_v38 = vadd.f32 %v427_v31, %v368_v36 }
 0x15a   :  { %v480_v41 = vadd.f32 %v479_v37, %v428_v38 }
 0x15b   :  { %v305_v42 = vpop.f32.mrf.mxu2 }
 0x15c   :  { %493 = vst.msk [vmem:[%s738_s2 + $0x30] sm:$0xff] %vm486_vm9, %v480_v41  ;;  %v306_v30 = vadd.f32 %v305_v42, %v243_v40 }
 0x15e   :  { %v374_v43 = vadd.f32 %v373_v35, %v306_v30 }
 0x160   :  { %v432_v45 = vadd.f32 %v431_v44, %v374_v43 }
 0x162   :  { %v484_v47 = vadd.f32 %v483_v46, %v432_v45 }
 0x164   :  { %494 = vst.msk [vmem:[%s738_s2 + $0x38] sm:$0xff] %vm486_vm9, %v484_v47 }

</bundles_post_ra>
